<compile_context>
chip_gen: v7x
topology: tpu7x:2x2x1
jax: 0.10.0
libtpu: 0.0.40
codegen_flags: <defaults>
</compile_context>

<pallas_src>
import numpy as np
import jax
import jax.numpy as jnp
from jax.experimental import pallas as pl
from jax.experimental.pallas import tpu as pltpu

# ---------------------------------------------------------------------------
# Deterministic stand-ins for the external config / simulator parameters.
# TODO(synk): exact STORM_DVS_simulator.batch_image_OTF_filter /
# load_configuration_parameters sources are unavailable; we use a thresholded
# Gaussian/OTF low-pass of GT as the mask and a fixed fluorophore density.
# ---------------------------------------------------------------------------
FLUOROPHORE_DENSITY = 0.5      # data_generation_parameters['fluorophore_density']
PSF_SIZE = 5                   # spatial-domain PSF (== OTF filter in Fourier)
PSF_SIGMA = 1.0
MASK_THRESHOLD = 1e-2

# 1-D normalized Gaussian taps; the 2-D PSF is exactly outer(g1, g1).
_ax = np.arange(PSF_SIZE, dtype=np.float64) - (PSF_SIZE - 1) / 2.0
_gw = np.exp(-(_ax ** 2) / (2.0 * PSF_SIGMA ** 2))
_G1 = tuple(float(v) for v in (_gw / _gw.sum()))


def _banded_gaussian(n, g1):
    """(n, n) banded matrix M with M[y, y+d-pad] = g1[d]; encodes the
    zero-padded 'same' 1-D Gaussian convolution as a matmul."""
    k = len(g1)
    pad = k // 2
    m = np.zeros((n, n), np.float32)
    for d in range(k):
        off = d - pad
        for y in range(n):
            h = y + off
            if 0 <= h < n:
                m[y, h] = g1[d]
    return m


def _pick_tb(N, H, W):
    """Images per grid step: largest divisor of N within a conservative VMEM
    budget (stays well under the default 32 MiB scoped limit on all TPU gens,
    including v7x's smaller physical VMEM)."""
    img_bytes = H * W * 4
    cap = max(1, min((1 << 20) // max(img_bytes, 1),   # ~1 MiB of image data / operand / step
                     1024 // max(H, 1)))               # keep kron(I_TB, Bh) <= 4 MiB
    tb = 1
    for d in range(1, N + 1):
        if N % d == 0 and d <= cap:
            tb = d
    if (tb * H) % 8 != 0:
        tb = N    # fall back: block == full array is always a legal BlockSpec
    return tb


# ---------------------------------------------------------------------------
# Pallas kernel: each grid step processes TB images flattened to (TB*H, W).
#   filt = Bh @ GT_block @ Bw   (separable zero-padded Gaussian, on the MXU)
#   acc += (pred-GT)^2 * where(filt > thr, 1/rho, 1)      (VALU)
# Final cross-lane reduction + (1,1) store only on the last grid step.
# ---------------------------------------------------------------------------
def _loss_kernel(pred_ref, gt_ref, bh_ref, bw_ref, out_ref, acc_ref):
    i = pl.program_id(0)

    @pl.when(i == 0)
    def _init():
        acc_ref[...] = jnp.zeros_like(acc_ref)

    pred = pred_ref[...].astype(jnp.float32)     # (TB*H, W)
    gt = gt_ref[...].astype(jnp.float32)         # (TB*H, W)

    diff = pred - gt
    d2 = diff * diff

    # Separable Gaussian low-pass as two banded matmuls (boundary zero-padding
    # is baked into the banded matrices; bh is block-diagonal across images).
    v = jnp.dot(bh_ref[...], gt, preferred_element_type=jnp.float32)      # rows
    filt = jnp.dot(v, bw_ref[...], preferred_element_type=jnp.float32)    # cols

    weight = jnp.where(filt > MASK_THRESHOLD,
                       jnp.float32(1.0 / FLUOROPHORE_DENSITY),
                       jnp.float32(1.0))
    acc_ref[...] = acc_ref[...] + d2 * weight

    @pl.when(i == pl.num_programs(0) - 1)
    def _finish():
        out_ref[...] = jnp.zeros((1, 1), jnp.float32) + jnp.sum(acc_ref[...])


# ---------------------------------------------------------------------------
# Wrapper (glue: reshape, constant filter matrices, final mean)
# ---------------------------------------------------------------------------
def psf_weighted_loss(predict, GT):
    B, C, H, W = predict.shape
    N = B * C
    tb = _pick_tb(N, H, W)
    tbh = tb * H

    # Free, contiguous reshape; dtype is preserved (bf16 stays bf16 in HBM).
    pred2 = predict.reshape(N * H, W)
    gt2 = GT.reshape(N * H, W)

    # Constant banded filter matrices (tiny; stay resident in VMEM).
    bh = jnp.asarray(np.kron(np.eye(tb, dtype=np.float32),
                             _banded_gaussian(H, _G1)))          # (tb*H, tb*H)
    bw = jnp.asarray(_banded_gaussian(W, _G1))                   # (W, W)

    total = pl.pallas_call(
        _loss_kernel,
        out_shape=jax.ShapeDtypeStruct((1, 1), jnp.float32),
        grid_spec=pltpu.PrefetchScalarGridSpec(
            num_scalar_prefetch=0,
            grid=(N // tb,),
            in_specs=[
                pl.BlockSpec((tbh, W), lambda i: (i, 0)),        # pred block
                pl.BlockSpec((tbh, W), lambda i: (i, 0)),        # GT block
                pl.BlockSpec((tbh, tbh), lambda i: (0, 0)),      # Bh (resident)
                pl.BlockSpec((W, W), lambda i: (0, 0)),          # Bw (resident)
            ],
            out_specs=pl.BlockSpec((1, 1), lambda i: (0, 0)),
            scratch_shapes=[pltpu.VMEM((tbh, W), jnp.float32)],  # elementwise acc
        ),
        compiler_params=pltpu.CompilerParams(
            dimension_semantics=("arbitrary",)),   # accumulator across the grid
    )(pred2, gt2, bh, bw)

    return total[0, 0] / jnp.float32(N * H * W)


# ---------------------------------------------------------------------------
# Pure-JAX reference for verification (slice-based separable conv)
# ---------------------------------------------------------------------------
def _ref_loss(predict, GT):
    B, C, H, W = predict.shape
    pad = PSF_SIZE // 2
    gt = GT.astype(jnp.float32)
    gp = jnp.pad(gt, ((0, 0), (0, 0), (pad, pad), (pad, pad)))
    v = jnp.zeros((B, C, H, W + 2 * pad), jnp.float32)
    for dy in range(PSF_SIZE):
        v = v + _G1[dy] * gp[:, :, dy:dy + H, :]
    filt = jnp.zeros((B, C, H, W), jnp.float32)
    for dx in range(PSF_SIZE):
        filt = filt + _G1[dx] * v[:, :, :, dx:dx + W]
    mask = (filt > MASK_THRESHOLD).astype(jnp.float32)
    diff = predict.astype(jnp.float32) - gt
    return jnp.mean((diff * mask) ** 2 / FLUOROPHORE_DENSITY
                    + (diff * (1.0 - mask)) ** 2)


if __name__ == "__main__":
    key = jax.random.PRNGKey(0)
    k1, k2 = jax.random.split(key)

    B, C, H, W = 2, 4, 16, 16
    # GT: sparse non-negative "fluorophore" image; predict: noisy estimate.
    GT = jnp.where(jax.random.uniform(k1, (B, C, H, W)) > 0.9,
                   jax.random.uniform(k2, (B, C, H, W)), 0.0).astype(jnp.float32)
    predict = GT + 0.1 * jax.random.normal(jax.random.PRNGKey(1), (B, C, H, W),
                                           dtype=jnp.float32)

    loss = jax.block_until_ready(psf_weighted_loss(predict, GT))
    ref = jax.block_until_ready(_ref_loss(predict, GT))

    np.testing.assert_allclose(np.asarray(loss), np.asarray(ref),
                               rtol=1e-4, atol=1e-6)
    print("KERNEL_OK")
</pallas_src>

<mosaic_0001>
module attributes {stable_mosaic.version = 11 : i64} {
  func.func @_loss_kernel(%arg0: i32, %arg1: memref<128x16xf32, #tpu.memory_space<vmem>>, %arg2: memref<128x16xf32, #tpu.memory_space<vmem>>, %arg3: memref<128x128xf32, #tpu.memory_space<vmem>>, %arg4: memref<16x16xf32, #tpu.memory_space<vmem>>, %arg5: memref<1x1xf32, #tpu.memory_space<vmem>>, %arg6: memref<128x16xf32, #tpu.memory_space<vmem>>) attributes {dimension_semantics = [#tpu.dimension_semantics<arbitrary>], iteration_bounds = array<i64: 1>, scalar_prefetch = 0 : i64, scratch_operands = 1 : i64, tpu.core_type = #tpu.core_type<tc>, window_params = [{transform_indices = @transform_0, window_bounds = array<i64: 128, 16>}, {transform_indices = @transform_1, window_bounds = array<i64: 128, 16>}, {pipeline_mode = #tpu.pipeline_mode<synchronous>, transform_indices = @transform_2, window_bounds = array<i64: 128, 128>}, {pipeline_mode = #tpu.pipeline_mode<synchronous>, transform_indices = @transform_3, window_bounds = array<i64: 16, 16>}, {pipeline_mode = #tpu.pipeline_mode<synchronous>, transform_indices = @transform_4, window_bounds = array<i64: 1, 1>}]} {
    %c0_i32 = arith.constant 0 : i32
    %0 = arith.cmpi eq, %arg0, %c0_i32 : i32
    %1 = arith.extui %0 : i1 to i32
    %c0_i32_0 = arith.constant 0 : i32
    %2 = arith.cmpi ne, %1, %c0_i32_0 : i32
    scf.if %2 {
      %cst_18 = arith.constant 0.000000e+00 : f32
      %23 = vector.broadcast %cst_18 : f32 to vector<128x16xf32>
      %c0_19 = arith.constant 0 : index
      %c0_20 = arith.constant 0 : index
      %24 = vector.load %arg6[%c0_19, %c0_20] : memref<128x16xf32, #tpu.memory_space<vmem>>, vector<128x16xf32>
      tpu.vector_store %arg6[%c0_19, %c0_20], %23 {strides = array<i32>} : memref<128x16xf32, #tpu.memory_space<vmem>>, vector<128x16xf32>,
    } else {
    }
    %c0 = arith.constant 0 : index
    %c0_1 = arith.constant 0 : index
    %3 = vector.load %arg1[%c0, %c0_1] : memref<128x16xf32, #tpu.memory_space<vmem>>, vector<128x16xf32>
    %c0_2 = arith.constant 0 : index
    %c0_3 = arith.constant 0 : index
    %4 = vector.load %arg2[%c0_2, %c0_3] : memref<128x16xf32, #tpu.memory_space<vmem>>, vector<128x16xf32>
    %5 = arith.subf %3, %4 : vector<128x16xf32>
    %6 = arith.mulf %5, %5 : vector<128x16xf32>
    %c0_4 = arith.constant 0 : index
    %c0_5 = arith.constant 0 : index
    %7 = vector.load %arg3[%c0_4, %c0_5] : memref<128x128xf32, #tpu.memory_space<vmem>>, vector<128x128xf32>
    %cst = arith.constant dense<0.000000e+00> : vector<128x16xf32>
    %8 = tpu.matmul %7, %4, %cst {dimension_numbers = #tpu.dot_dimension_numbers<[1], [0], [0], [1], [0, 0, 1, 1], [], []>} : vector<128x128xf32>, vector<128x16xf32>, vector<128x16xf32> -> vector<128x16xf32>
    %c0_6 = arith.constant 0 : index
    %c0_7 = arith.constant 0 : index
    %9 = vector.load %arg4[%c0_6, %c0_7] : memref<16x16xf32, #tpu.memory_space<vmem>>, vector<16x16xf32>
    %cst_8 = arith.constant dense<0.000000e+00> : vector<128x16xf32>
    %10 = tpu.matmul %8, %9, %cst_8 {dimension_numbers = #tpu.dot_dimension_numbers<[1], [0], [0], [1], [0, 0, 1, 1], [], []>} : vector<128x16xf32>, vector<16x16xf32>, vector<128x16xf32> -> vector<128x16xf32>
    %cst_9 = arith.constant 0.00999999977 : f32
    %11 = vector.broadcast %cst_9 : f32 to vector<128x16xf32>
    %12 = arith.cmpf ogt, %10, %11 : vector<128x16xf32>
    %cst_10 = arith.constant 2.000000e+00 : f32
    %cst_11 = arith.constant 1.000000e+00 : f32
    %13 = vector.broadcast %cst_10 : f32 to vector<128x16xf32>
    %14 = vector.broadcast %cst_11 : f32 to vector<128x16xf32>
    %15 = arith.select %12, %13, %14 : vector<128x16xi1>, vector<128x16xf32>
    %c0_12 = arith.constant 0 : index
    %c0_13 = arith.constant 0 : index
    %16 = vector.load %arg6[%c0_12, %c0_13] : memref<128x16xf32, #tpu.memory_space<vmem>>, vector<128x16xf32>
    %17 = arith.mulf %6, %15 : vector<128x16xf32>
    %18 = arith.addf %16, %17 : vector<128x16xf32>
    %c0_14 = arith.constant 0 : index
    %c0_15 = arith.constant 0 : index
    %19 = vector.load %arg6[%c0_14, %c0_15] : memref<128x16xf32, #tpu.memory_space<vmem>>, vector<128x16xf32>
    tpu.vector_store %arg6[%c0_14, %c0_15], %18 {strides = array<i32>} : memref<128x16xf32, #tpu.memory_space<vmem>>, vector<128x16xf32>,
    %c0_i32_16 = arith.constant 0 : i32
    %20 = arith.cmpi eq, %arg0, %c0_i32_16 : i32
    %21 = arith.extui %20 : i1 to i32
    %c0_i32_17 = arith.constant 0 : i32
    %22 = arith.cmpi ne, %21, %c0_i32_17 : i32
    scf.if %22 {
      %cst_18 = arith.constant 0.000000e+00 : f32
      %23 = vector.broadcast %cst_18 : f32 to vector<1x1xf32>
      %c0_19 = arith.constant 0 : index
      %c0_20 = arith.constant 0 : index
      %24 = vector.load %arg6[%c0_19, %c0_20] : memref<128x16xf32, #tpu.memory_space<vmem>>, vector<128x16xf32>
      %25 = vector.shape_cast %24 : vector<128x16xf32> to vector<1x128x16xf32>
      %cst_21 = arith.constant dense<0.000000e+00> : vector<1xf32>
      %26 = vector.multi_reduction <add>, %25, %cst_21 [1, 2] : vector<1x128x16xf32> to vector<1xf32>
      %27 = vector.shape_cast %26 : vector<1xf32> to vector<1x1x1xf32>
      %28 = vector.extract %27[0, 0, 0] : f32 from vector<1x1x1xf32>
      %29 = vector.broadcast %28 : f32 to vector<1x1xf32>
      %30 = arith.addf %23, %29 : vector<1x1xf32>
      %c0_22 = arith.constant 0 : index
      %c0_23 = arith.constant 0 : index
      %31 = vector.load %arg5[%c0_22, %c0_23] : memref<1x1xf32, #tpu.memory_space<vmem>>, vector<1x1xf32>
      tpu.vector_store %arg5[%c0_22, %c0_23], %30 {strides = array<i32>} : memref<1x1xf32, #tpu.memory_space<vmem>>, vector<1x1xf32>,
    } else {
    }
    return
  }
  func.func @transform_0(%arg0: i32) -> (i32, i32) {
    %c0_i32 = arith.constant 0 : i32
    %c0_i32_0 = arith.constant 0 : i32
    return %arg0, %c0_i32 : i32, i32
  }
  func.func @transform_1(%arg0: i32) -> (i32, i32) {
    %c0_i32 = arith.constant 0 : i32
    %c0_i32_0 = arith.constant 0 : i32
    return %arg0, %c0_i32 : i32, i32
  }
  func.func @transform_2(%arg0: i32) -> (i32, i32) {
    %c0_i32 = arith.constant 0 : i32
    %c0_i32_0 = arith.constant 0 : i32
    %c0_i32_1 = arith.constant 0 : i32
    return %c0_i32, %c0_i32_0 : i32, i32
  }
  func.func @transform_3(%arg0: i32) -> (i32, i32) {
    %c0_i32 = arith.constant 0 : i32
    %c0_i32_0 = arith.constant 0 : i32
    %c0_i32_1 = arith.constant 0 : i32
    return %c0_i32, %c0_i32_0 : i32, i32
  }
  func.func @transform_4(%arg0: i32) -> (i32, i32) {
    %c0_i32 = arith.constant 0 : i32
    %c0_i32_0 = arith.constant 0 : i32
    %c0_i32_1 = arith.constant 0 : i32
    return %c0_i32, %c0_i32_0 : i32, i32
  }
}

</mosaic_0001>

<bundles_post_ra>
// kernel: tpu_custom_call.1
= control target key start
LH: loop header
LB: loop body
LE: loop exit
PB: predicated region body
PF: predicated region fallthrough
CT: control target
= control target key end

     0   :  { %s1182_s0 = inlined_call_operand.vmem [shape: f32[128,16], index: 0, kind: input, shape index: {}]   ;;  %s1183_s1 = inlined_call_operand.vmem [shape: f32[128,16], index: 1, kind: input, shape index: {}]   ;;  %s1184_s2 = inlined_call_operand.vmem [shape: f32[128,128], index: 2, kind: input, shape index: {}]   ;;  %s1185_s3 = inlined_call_operand.vmem [shape: f32[16,16], index: 3, kind: input, shape index: {}]   ;;  %s1186_s4 = inlined_call_operand.hbm [shape: f32[1,1], index: 4, kind: output, shape index: {}]  }
   0x1   :  { %v879_v0 = vld [vmem:[%s1183_s1] sm:$0xff]  ;;  %v884_v1 = vld [vmem:[%s1183_s1 + $0x8] sm:$0xff]  ;;  %v889_v2 = vld [vmem:[%s1183_s1 + $0x10] sm:$0xff] }
   0x2   :  { %v894_v3 = vld [vmem:[%s1183_s1 + $0x18] sm:$0xff]  ;;  %v783_v4 = vpack.c.bf16 %v884_v1, %v879_v0  ;;  %v903_v6 = vld [vmem:[%s1183_s1 + $0x20] sm:$0xff]  ;;  %v908_v7 = vld [vmem:[%s1183_s1 + $0x28] sm:$0xff] }
   0x3   :  { %v787_v5 = vpack.c.bf16 %v894_v3, %v889_v2  ;;  %v791_v8 = vpack.c.bf16 %v908_v7, %v903_v6  ;;  %v103_v9 = vld [vmem:[%s1184_s2] sm:$0xff]  ;;  %v918_v10 = vld [vmem:[%s1183_s1 + $0x30] sm:$0xff]  ;;  %v923_v11 = vld [vmem:[%s1183_s1 + $0x38] sm:$0xff] }
   0x4   :  { %784 = vmatprep.subr.bf16.mxu0 %v783_v4  ;;  %731 = vmatprep.mubr.f32.mxu0 %v103_v9  ;;  %v795_v12 = vpack.c.bf16 %v923_v11, %v918_v10  ;;  %v930_v13 = vld [vmem:[%s1183_s1 + $0x40] sm:$0xff]  ;;  %v935_v14 = vld [vmem:[%s1183_s1 + $0x48] sm:$0xff] }
   0x5   :  { %786 = vmatpush3.bf16.msra.mxu0 %v783_v4  ;;  %v264_v15 = vld [vmem:[%s1185_s3] sm:$0xff]  ;;  %v265_v16 = vld [vmem:[%s1185_s3 + $0x8] sm:$0xff] }
   0x6   :  { %788 = vmatprep.subr.bf16.mxu0 %v787_v5  ;;  %v815_v17 = vpack.c.bf16 %v265_v16, %v264_v15 }
   0x9   :  { %790 = vmatpush3.bf16.msra.mxu0 %v787_v5 }
   0xa   :  { %792 = vmatprep.subr.bf16.mxu0 %v791_v8 }
   0xb   :  { %9 = vsyncpa [#allocation4], 0  ;;  %v799_v18 = vpack.c.bf16 %v935_v14, %v930_v13  ;;  %816 = vmatprep.subr.bf16.mxu1 %v815_v17  ;;  %v948_v19 = vld [vmem:[%s1183_s1 + $0x50] sm:$0xff]  ;;  %v953_v20 = vld [vmem:[%s1183_s1 + $0x58] sm:$0xff]  ;;  %vm22_vm0 = vcmask 130048   ;;  %v848_v43 = vmov 0.0  }
   0xc   :  { %818 = vmatpush3.bf16.msra.mxu1 %v815_v17  ;;  %v803_v21 = vpack.c.bf16 %v953_v20, %v948_v19  ;;  %v960_v22 = vld [vmem:[%s1183_s1 + $0x60] sm:$0xff]  ;;  %v965_v23 = vld [vmem:[%s1183_s1 + $0x68] sm:$0xff]  ;;  %v972_v25 = vld [vmem:[%s1183_s1 + $0x70] sm:$0xff]  ;;  %24 = vst.msk [vmem:[#allocation2 + $0x8] sm:$0xff] %vm22_vm0, %v848_v43 }
   0xd   :  { %794 = vmatpush3.bf16.msra.mxu0 %v791_v8  ;;  %v807_v24 = vpack.c.bf16 %v965_v23, %v960_v22  ;;  %v977_v26 = vld [vmem:[%s1183_s1 + $0x78] sm:$0xff]  ;;  %v104_v28 = vld [vmem:[%s1184_s2 + $0x8] sm:$0xff]  ;;  %v105_v29 = vld [vmem:[%s1184_s2 + $0x10] sm:$0xff]  ;;  %23 = vst.msk [vmem:[#allocation2] sm:$0xff] %vm22_vm0, %v848_v43 }
   0xe   :  { %796 = vmatprep.subr.bf16.mxu0 %v795_v12  ;;  %v811_v27 = vpack.c.bf16 %v977_v26, %v972_v25  ;;  %v106_v30 = vld [vmem:[%s1184_s2 + $0x18] sm:$0xff]  ;;  %v107_v31 = vld [vmem:[%s1184_s2 + $0x20] sm:$0xff]  ;;  %v108_v32 = vld [vmem:[%s1184_s2 + $0x28] sm:$0xff]  ;;  %25 = vst.msk [vmem:[#allocation2 + $0x10] sm:$0xff] %vm22_vm0, %v848_v43 }
   0xf   :  { %v109_v33 = vld [vmem:[%s1184_s2 + $0x30] sm:$0xff]  ;;  %v110_v34 = vld [vmem:[%s1184_s2 + $0x38] sm:$0xff]  ;;  %v111_v35 = vld [vmem:[%s1184_s2 + $0x40] sm:$0xff]  ;;  %26 = vst.msk [vmem:[#allocation2 + $0x18] sm:$0xff] %vm22_vm0, %v848_v43 }
  0x10   :  { %v112_v36 = vld [vmem:[%s1184_s2 + $0x48] sm:$0xff]  ;;  %v113_v37 = vld [vmem:[%s1184_s2 + $0x50] sm:$0xff]  ;;  %v114_v38 = vld [vmem:[%s1184_s2 + $0x58] sm:$0xff]  ;;  %27 = vst.msk [vmem:[#allocation2 + $0x20] sm:$0xff] %vm22_vm0, %v848_v43 }
  0x11   :  { %798 = vmatpush3.bf16.msra.mxu0 %v795_v12  ;;  %v115_v39 = vld [vmem:[%s1184_s2 + $0x60] sm:$0xff]  ;;  %v116_v40 = vld [vmem:[%s1184_s2 + $0x68] sm:$0xff]  ;;  %v117_v41 = vld [vmem:[%s1184_s2 + $0x70] sm:$0xff]  ;;  %28 = vst.msk [vmem:[#allocation2 + $0x28] sm:$0xff] %vm22_vm0, %v848_v43 }
  0x12   :  { %800 = vmatprep.subr.bf16.mxu0 %v799_v18  ;;  %v118_v42 = vld [vmem:[%s1184_s2 + $0x78] sm:$0xff]  ;;  %29 = vst.msk [vmem:[#allocation2 + $0x30] sm:$0xff] %vm22_vm0, %v848_v43  ;;  %30 = vst.msk [vmem:[#allocation2 + $0x38] sm:$0xff] %vm22_vm0, %v848_v43  ;;  %v40_v60 = vld [vmem:[%s1182_s0 + $0x8] sm:$0xff] }
  0x13   :  { %31 = vst.msk [vmem:[#allocation2 + $0x40] sm:$0xff] %vm22_vm0, %v848_v43  ;;  %32 = vst.msk [vmem:[#allocation2 + $0x48] sm:$0xff] %vm22_vm0, %v848_v43  ;;  %v39_v61 = vld [vmem:[%s1182_s0] sm:$0xff]  ;;  %v72_v62 = vsub.f32 %v40_v60, %v884_v1  ;;  %v42_v4 = vld [vmem:[%s1182_s0 + $0x18] sm:$0xff] }
  0x14   :  { %33 = vst.msk [vmem:[#allocation2 + $0x50] sm:$0xff] %vm22_vm0, %v848_v43  ;;  %34 = vst.msk [vmem:[#allocation2 + $0x58] sm:$0xff] %vm22_vm0, %v848_v43  ;;  %v71_v63 = vsub.f32 %v39_v61, %v879_v0  ;;  %v41_v5 = vld [vmem:[%s1182_s0 + $0x10] sm:$0xff]  ;;  %v74_v9 = vsub.f32 %v42_v4, %v894_v3  ;;  %v44_v1 = vld [vmem:[%s1182_s0 + $0x28] sm:$0xff] }
  0x15   :  { %802 = vmatpush3.bf16.msra.mxu0 %v799_v18  ;;  %35 = vst.msk [vmem:[#allocation2 + $0x60] sm:$0xff] %vm22_vm0, %v848_v43  ;;  %36 = vst.msk [vmem:[#allocation2 + $0x68] sm:$0xff] %vm22_vm0, %v848_v43  ;;  %v88_v8 = vmul.f32 %v72_v62, %v72_v62  ;;  %v73_v16 = vsub.f32 %v41_v5, %v889_v2  ;;  %v43_v17 = vld [vmem:[%s1182_s0 + $0x20] sm:$0xff]  ;;  %v849_v18 = vmov 1.0   ;;  %v50_v62 = vld [vmem:[%s1182_s0 + $0x58] sm:$0xff] }
  0x16   :  { %804 = vmatprep.subr.bf16.mxu0 %v803_v21  ;;  %37 = vst.msk [vmem:[#allocation2 + $0x70] sm:$0xff] %vm22_vm0, %v848_v43  ;;  %38 = vst.msk [vmem:[#allocation2 + $0x78] sm:$0xff] %vm22_vm0, %v848_v43  ;;  %v87_v12 = vmul.f32 %v71_v63, %v71_v63  ;;  %v90_v2 = vmul.f32 %v74_v9, %v74_v9  ;;  %v49_v4 = vld [vmem:[%s1182_s0 + $0x50] sm:$0xff] }
  0x19   :  { %806 = vmatpush3.bf16.msra.mxu0 %v803_v21 }
  0x1a   :  { %808 = vmatprep.subr.bf16.mxu0 %v807_v24 }
  0x1d   :  { %810 = vmatpush3.bf16.msra.mxu0 %v807_v24  ;;  %v493_v24 = vld [vmem:[#allocation2 + $0x8] sm:$0xff] }
  0x1e   :  { %812 = vmatprep.subr.bf16.mxu0 %v811_v27 }
  0x21   :  { %814 = vmatpush3.bf16.msra.mxu0 %v811_v27 }
  0x24   :  { %732 = vmatmul.mubr.f32.vlgmr.msra.gmra.mrb[0].mxu0 %v104_v28  ;;  %v492_v28 = vld [vmem:[#allocation2] sm:$0xff] }
  0x25   :  { %734 = vmatprep.mubr.f32.mxu0 %v105_v29  ;;  %v76_v29 = vsub.f32 %v44_v1, %v908_v7  ;;  %v495_v7 = vld [vmem:[#allocation2 + $0x18] sm:$0xff] }
  0x28   :  { %735 = vmatmul.mubr.f32.gmra.mrb[2].mxu0 %v106_v30 }
  0x29   :  { %737 = vmatprep.mubr.f32.mxu0 %v107_v31 }
  0x2c   :  { %738 = vmatmul.mubr.f32.gmra.mrb[4].mxu0 %v108_v32  ;;  %v89_v32 = vmul.f32 %v73_v16, %v73_v16 }
  0x2d   :  { %740 = vmatprep.mubr.f32.mxu0 %v109_v33  ;;  %v75_v33 = vsub.f32 %v43_v17, %v903_v6 }
  0x30   :  { %741 = vmatmul.mubr.f32.gmra.mrb[6].mxu0 %v110_v34  ;;  %v46_v34 = vld [vmem:[%s1182_s0 + $0x38] sm:$0xff] }
  0x31   :  { %743 = vmatprep.mubr.f32.mxu0 %v111_v35  ;;  %v78_v43 = vsub.f32 %v46_v34, %v923_v11 }
  0x34   :  { %744 = vmatmul.mubr.f32.gmra.mrb[8].mxu0 %v112_v36 }
  0x35   :  { %746 = vmatprep.mubr.f32.mxu0 %v113_v37  ;;  %v45_v37 = vld [vmem:[%s1182_s0 + $0x30] sm:$0xff] }
  0x38   :  { %747 = vmatmul.mubr.f32.gmra.mrb[10].mxu0 %v114_v38 }
  0x39   :  { %749 = vmatprep.mubr.f32.mxu0 %v115_v39 }
  0x3c   :  { %750 = vmatmul.mubr.f32.gmra.mrb[12].mxu0 %v116_v40 }
  0x3d   :  { %752 = vmatprep.mubr.f32.mxu0 %v117_v41  ;;  %v494_v41 = vld [vmem:[#allocation2 + $0x10] sm:$0xff] }
  0x40   :  { %753 = vmatmul.mubr.f32.gmra.mrb[14].mxu0 %v118_v42  ;;  %v92_v42 = vmul.f32 %v76_v29, %v76_v29 }
  0xf7   :  { %v733_v44 = vpop.f32.mrb[0].mxu0 }
  0xf8   :  { %v185_v45 = vpop.f32.mrb[1].mxu0 }
  0xf9   :  { %759 = vmatprep.mubr.msk.f32.mxu1 %vm22_vm0, %v185_v45 }
  0xfa   :  { %760 = vmatmul.mubr.msk.f32.vlgmr.msra.gmra.mrb[0].mxu1 %vm22_vm0, %v733_v44  ;;  %v48_v44 = vld [vmem:[%s1182_s0 + $0x48] sm:$0xff] }
  0xfb   :  { %v736_v46 = vpop.f32.mrb[2].mxu0 }
  0xfc   :  { %v195_v47 = vpop.f32.mrb[3].mxu0 }
  0xfd   :  { %762 = vmatprep.mubr.msk.f32.mxu1 %vm22_vm0, %v195_v47  ;;  %v91_v47 = vmul.f32 %v75_v33, %v75_v33 }
  0xfe   :  { %763 = vmatmul.mubr.msk.f32.gmra.mrb[2].mxu1 %vm22_vm0, %v736_v46 }
  0xff   :  { %v739_v48 = vpop.f32.mrb[4].mxu0 }
 0x100   :  { %v205_v49 = vpop.f32.mrb[5].mxu0 }
 0x101   :  { %765 = vmatprep.mubr.msk.f32.mxu1 %vm22_vm0, %v205_v49  ;;  %v47_v49 = vld [vmem:[%s1182_s0 + $0x40] sm:$0xff] }
 0x102   :  { %766 = vmatmul.mubr.msk.f32.gmra.mrb[4].mxu1 %vm22_vm0, %v739_v48  ;;  %v77_v48 = vsub.f32 %v45_v37, %v918_v10  ;;  %v496_v10 = vld [vmem:[#allocation2 + $0x20] sm:$0xff] }
 0x103   :  { %v742_v50 = vpop.f32.mrb[6].mxu0  ;;  %v500_v37 = vld [vmem:[#allocation2 + $0x40] sm:$0xff] }
 0x104   :  { %v215_v51 = vpop.f32.mrb[7].mxu0  ;;  %v93_v61 = vmul.f32 %v77_v48, %v77_v48  ;;  %v53_v48 = vld [vmem:[%s1182_s0 + $0x70] sm:$0xff] }
 0x105   :  { %768 = vmatprep.mubr.msk.f32.mxu1 %vm22_vm0, %v215_v51 }
 0x106   :  { %769 = vmatmul.mubr.msk.f32.gmra.mrb[6].mxu1 %vm22_vm0, %v742_v50 }
 0x107   :  { %v745_v52 = vpop.f32.mrb[8].mxu0 }
 0x108   :  { %v225_v53 = vpop.f32.mrb[9].mxu0 }
 0x109   :  { %771 = vmatprep.mubr.msk.f32.mxu1 %vm22_vm0, %v225_v53  ;;  %v497_v53 = vld [vmem:[#allocation2 + $0x28] sm:$0xff] }
 0x10a   :  { %772 = vmatmul.mubr.msk.f32.gmra.mrb[8].mxu1 %vm22_vm0, %v745_v52 }
 0x10b   :  { %v748_v54 = vpop.f32.mrb[10].mxu0 }
 0x10c   :  { %v235_v55 = vpop.f32.mrb[11].mxu0 }
 0x10d   :  { %774 = vmatprep.mubr.msk.f32.mxu1 %vm22_vm0, %v235_v55 }
 0x10e   :  { %775 = vmatmul.mubr.msk.f32.gmra.mrb[10].mxu1 %vm22_vm0, %v748_v54  ;;  %v80_v54 = vsub.f32 %v48_v44, %v935_v14 }
 0x10f   :  { %v751_v56 = vpop.f32.mrb[12].mxu0 }
 0x110   :  { %v245_v57 = vpop.f32.mrb[13].mxu0  ;;  %v96_v9 = vmul.f32 %v80_v54, %v80_v54  ;;  %v502_v54 = vld [vmem:[#allocation2 + $0x50] sm:$0xff] }
 0x111   :  { %777 = vmatprep.mubr.msk.f32.mxu1 %vm22_vm0, %v245_v57  ;;  %v94_v57 = vmul.f32 %v78_v43, %v78_v43  ;;  %v54_v43 = vld [vmem:[%s1182_s0 + $0x78] sm:$0xff] }
 0x112   :  { %778 = vmatmul.mubr.msk.f32.gmra.mrb[12].mxu1 %vm22_vm0, %v751_v56 }
 0x113   :  { %v754_v58 = vpop.f32.mrb[14].mxu0 }
 0x114   :  { %v255_v59 = vpop.f32.mrb[15].mxu0 }
 0x115   :  { %780 = vmatprep.mubr.msk.f32.mxu1 %vm22_vm0, %v255_v59 }
 0x116   :  { %781 = vmatmul.mubr.msk.f32.gmra.mrb[14].mxu1 %vm22_vm0, %v754_v58  ;;  %v79_v58 = vsub.f32 %v47_v49, %v930_v13  ;;  %v499_v13 = vld [vmem:[#allocation2 + $0x38] sm:$0xff] }
 0x118   :  { %v95_v17 = vmul.f32 %v79_v58, %v79_v58 }
 0x1cd   :  { %v761_v15 = vpop.f32.mrb[0].mxu1 }
 0x1ce   :  { %vm461_vm1 = vcmp.gt.f32.partialorder %v761_v15, 0.01  ;;  %v381_v0 = vpop.f32.mrb[1].mxu1 }
 0x1cf   :  { %v477_v21 = vsel %vm461_vm1, 2.0, %v849_v18  ;;  %vm460_vm2 = vcmp.gt.f32.partialorder %v381_v0, 0.01  ;;  %v498_v0 = vld [vmem:[#allocation2 + $0x30] sm:$0xff] }
 0x1d0   :  { %v509_v3 = vmul.f32 %v477_v21, %v88_v8  ;;  %v476_v27 = vsel %vm460_vm2, 2.0, %v849_v18  ;;  %v82_v21 = vsub.f32 %v50_v62, %v953_v20  ;;  %v51_v20 = vld [vmem:[%s1182_s0 + $0x60] sm:$0xff]  ;;  %vm617_vm2 = vcmask 0  }
 0x1d1   :  { %v508_v30 = vmul.f32 %v476_v27, %v87_v12  ;;  %v764_v31 = vpop.f32.mrb[2].mxu1  ;;  %v52_v12 = vld [vmem:[%s1182_s0 + $0x68] sm:$0xff]  ;;  %s850_s0 = smov [#allocation3]  }
 0x1d2   :  { %v525_v35 = vadd.f32 %v509_v3, %v493_v24  ;;  %vm463_vm3 = vcmp.gt.f32.partialorder %v764_v31, 0.01  ;;  %v391_v36 = vpop.f32.mrb[3].mxu1  ;;  %s625_s1 = sshll.u32 %s850_s0, 4  ;;  %s626_s1 = int_to_ptr.vmem [resolvable:$true] %s625_s1 }
 0x1d3   :  { %v524_v38 = vadd.f32 %v508_v30, %v492_v28  ;;  %v479_v39 = vsel %vm463_vm3, 2.0, %v849_v18  ;;  %vm462_vm4 = vcmp.gt.f32.partialorder %v391_v36, 0.01  ;;  %v81_v28 = vsub.f32 %v49_v4, %v948_v19  ;;  %s824_s5 = scalar_lea.vmem %s626_s1, 16  ;;  %s828_s6 = scalar_lea.vmem %s626_s1, 32 }
 0x1d4   :  { %541 = vst.msk [vmem:[#allocation2 + $0x8] sm:$0xff] %vm22_vm0, %v525_v35  ;;  %v511_v40 = vmul.f32 %v479_v39, %v90_v2  ;;  %v478_v6 = vsel %vm462_vm4, 2.0, %v849_v18  ;;  %v501_v35 = vld [vmem:[#allocation2 + $0x48] sm:$0xff]  ;;  %p825_p0 = scmp.ne.s32.totalorder %s626_s1, %s824_s5  ;;  %p829_p1 = scmp.lt.s32.totalorder %s626_s1, %s626_s1 }
 0x1d5   :  { %540 = vst.msk [vmem:[#allocation2] sm:$0xff] %vm22_vm0, %v524_v38  ;;  %v510_v45 = vmul.f32 %v478_v6, %v89_v32  ;;  %v767_v46 = vpop.f32.mrb[4].mxu1  ;;  %v84_v32 = vsub.f32 %v52_v12, %v965_v23  ;;  %v98_v38 = vmul.f32 %v82_v21, %v82_v21  ;;  %p830_p2 = scmp.lt.s32.totalorder %s828_s6, %s824_s5 }
 0x1d6   :  { %v527_v50 = vadd.f32 %v511_v40, %v495_v7  ;;  %vm465_vm5 = vcmp.gt.f32.partialorder %v767_v46, 0.01  ;;  %v401_v51 = vpop.f32.mrb[5].mxu1 }
 0x1d7   :  { %v526_v52 = vadd.f32 %v510_v45, %v494_v41  ;;  %v481_v11 = vsel %vm465_vm5, 2.0, %v849_v18  ;;  %vm464_vm6 = vcmp.gt.f32.partialorder %v401_v51, 0.01  ;;  %v97_v41 = vmul.f32 %v81_v28, %v81_v28  ;;  %p831_p3 = por %p830_p2, %p829_p1 }
 0x1d8   :  { %543 = vst.msk [vmem:[#allocation2 + $0x18] sm:$0xff] %vm22_vm0, %v527_v50  ;;  %v513_v55 = vmul.f32 %v481_v11, %v92_v42  ;;  %v480_v56 = vsel %vm464_vm6, 2.0, %v849_v18  ;;  %v83_v42 = vsub.f32 %v51_v20, %v960_v22 }
 0x1d9   :  { %542 = vst.msk [vmem:[#allocation2 + $0x10] sm:$0xff] %vm22_vm0, %v526_v52  ;;  %v512_v59 = vmul.f32 %v480_v56, %v91_v47  ;;  %v770_v60 = vpop.f32.mrb[6].mxu1  ;;  %v100_v47 = vmul.f32 %v84_v32, %v84_v32  ;;  %v503_v52 = vld [vmem:[#allocation2 + $0x58] sm:$0xff]  ;;  %p832_p4 = pnand %p831_p3, %p825_p0 }
 0x1da   :  { %v529_v63 = vadd.f32 %v513_v55, %v497_v53  ;;  %vm467_vm7 = vcmp.gt.f32.partialorder %v770_v60, 0.01  ;;  %v411_v14 = vpop.f32.mrb[7].mxu1  ;;  %v86_v55 = vsub.f32 %v54_v43, %v977_v26  ;;  %v99_v60 = vmul.f32 %v83_v42, %v83_v42  ;;  %v505_v26 = vld [vmem:[#allocation2 + $0x68] sm:$0xff] }
 0x1db   :  { %v528_v5 = vadd.f32 %v512_v59, %v496_v10  ;;  %v483_v8 = vsel %vm467_vm7, 2.0, %v849_v18  ;;  %vm466_vm8 = vcmp.gt.f32.partialorder %v411_v14, 0.01  ;;  %v560_v15 = vld [vmem:[#allocation2 + $0x8] sm:$0xff] }
 0x1dc   :  { %545 = vst.msk [vmem:[#allocation2 + $0x28] sm:$0xff] %vm22_vm0, %v529_v63  ;;  %v515_v16 = vmul.f32 %v483_v8, %v94_v57  ;;  %v482_v1 = vsel %vm466_vm8, 2.0, %v849_v18  ;;  %v559_v24 = vld [vmem:[#allocation2] sm:$0xff]  ;;  %v576_v29 = vsel %vm22_vm0, %v560_v15, 0.0 }
 0x1dd   :  { %544 = vst.msk [vmem:[#allocation2 + $0x20] sm:$0xff] %vm22_vm0, %v528_v5  ;;  %v514_v3 = vmul.f32 %v482_v1, %v93_v61  ;;  %v773_v27 = vpop.f32.mrb[8].mxu1  ;;  %v575_v2 = vsel %vm22_vm0, %v559_v24, 0.0  ;;  %v85_v61 = vsub.f32 %v53_v48, %v972_v25  ;;  %v504_v15 = vld [vmem:[#allocation2 + $0x60] sm:$0xff]  ;;  %v102_v25 = vmul.f32 %v86_v55, %v86_v55 }
 0x1de   :  { %v531_v30 = vadd.f32 %v515_v16, %v499_v13  ;;  %vm469_vm9 = vcmp.gt.f32.partialorder %v773_v27, 0.01  ;;  %v421_v31 = vpop.f32.mrb[9].mxu1  ;;  %v577_v40 = vadd.f32 %v576_v29, %v575_v2 }
 0x1df   :  { %v530_v33 = vadd.f32 %v514_v3, %v498_v0  ;;  %v485_v34 = vsel %vm469_vm9, 2.0, %v849_v18  ;;  %vm468_vm10 = vcmp.gt.f32.partialorder %v421_v31, 0.01  ;;  %v562_v7 = vld [vmem:[#allocation2 + $0x18] sm:$0xff]  ;;  %v101_v24 = vmul.f32 %v85_v61, %v85_v61 }
 0x1e0   :  { %547 = vst.msk [vmem:[#allocation2 + $0x38] sm:$0xff] %vm22_vm0, %v531_v30  ;;  %v517_v19 = vmul.f32 %v485_v34, %v96_v9  ;;  %v484_v36 = vsel %vm468_vm10, 2.0, %v849_v18  ;;  %v561_v39 = vld [vmem:[#allocation2 + $0x10] sm:$0xff]  ;;  %v580_v22 = vsel %vm22_vm0, %v562_v7, 0.0  ;;  %v507_v31 = vld [vmem:[#allocation2 + $0x78] sm:$0xff] }
 0x1e1   :  { %546 = vst.msk [vmem:[#allocation2 + $0x30] sm:$0xff] %vm22_vm0, %v530_v33  ;;  %v516_v23 = vmul.f32 %v484_v36, %v95_v17  ;;  %v776_v6 = vpop.f32.mrb[10].mxu1  ;;  %v578_v44 = vsel %vm22_vm0, %v561_v39, 0.0  ;;  %v506_v34 = vld [vmem:[#allocation2 + $0x70] sm:$0xff] }
 0x1e2   :  { %v533_v45 = vadd.f32 %v517_v19, %v501_v35  ;;  %vm471_vm11 = vcmp.gt.f32.partialorder %v776_v6, 0.01  ;;  %v431_v46 = vpop.f32.mrb[11].mxu1  ;;  %v579_v49 = vadd.f32 %v578_v44, %v577_v40 }
 0x1e3   :  { %v532_v50 = vadd.f32 %v516_v23, %v500_v37  ;;  %v487_v51 = vsel %vm471_vm11, 2.0, %v849_v18  ;;  %vm470_vm12 = vcmp.gt.f32.partialorder %v431_v46, 0.01  ;;  %v564_v10 = vld [vmem:[#allocation2 + $0x28] sm:$0xff] }
 0x1e4   :  { %549 = vst.msk [vmem:[#allocation2 + $0x48] sm:$0xff] %vm22_vm0, %v533_v45  ;;  %v519_v11 = vmul.f32 %v487_v51, %v98_v38  ;;  %v486_v53 = vsel %vm470_vm12, 2.0, %v849_v18  ;;  %v563_v56 = vld [vmem:[#allocation2 + $0x20] sm:$0xff]  ;;  %v581_v57 = vadd.f32 %v580_v22, %v579_v49  ;;  %v584_v13 = vsel %vm22_vm0, %v564_v10, 0.0 }
 0x1e5   :  { %548 = vst.msk [vmem:[#allocation2 + $0x40] sm:$0xff] %vm22_vm0, %v532_v50  ;;  %v518_v58 = vmul.f32 %v486_v53, %v97_v41  ;;  %v779_v59 = vpop.f32.mrb[12].mxu1  ;;  %v582_v62 = vsel %vm22_vm0, %v563_v56, 0.0 }
 0x1e6   :  { %v535_v63 = vadd.f32 %v519_v11, %v503_v52  ;;  %vm473_vm13 = vcmp.gt.f32.partialorder %v779_v59, 0.01  ;;  %v441_v14 = vpop.f32.mrb[13].mxu1  ;;  %v583_v4 = vadd.f32 %v582_v62, %v581_v57 }
 0x1e7   :  { %v534_v5 = vadd.f32 %v518_v58, %v502_v54  ;;  %v489_v8 = vsel %vm473_vm13, 2.0, %v849_v18  ;;  %vm472_vm14 = vcmp.gt.f32.partialorder %v441_v14, 0.01  ;;  %v566_v1 = vld [vmem:[#allocation2 + $0x38] sm:$0xff] }
 0x1e8   :  { %551 = vst.msk [vmem:[#allocation2 + $0x58] sm:$0xff] %vm22_vm0, %v535_v63  ;;  %v521_v9 = vmul.f32 %v489_v8, %v100_v47  ;;  %v488_v12 = vsel %vm472_vm14, 2.0, %v849_v18  ;;  %v565_v16 = vld [vmem:[#allocation2 + $0x30] sm:$0xff]  ;;  %v585_v0 = vadd.f32 %v584_v13, %v583_v4  ;;  %v588_v32 = vsel %vm22_vm0, %v566_v1, 0.0 }
 0x1e9   :  { %550 = vst.msk [vmem:[#allocation2 + $0x50] sm:$0xff] %vm22_vm0, %v534_v5  ;;  %v520_v17 = vmul.f32 %v488_v12, %v99_v60  ;;  %v782_v21 = vpop.f32.mrb[14].mxu1  ;;  %v586_v3 = vsel %vm22_vm0, %v565_v16, 0.0 }
 0x1ea   :  { %v537_v27 = vadd.f32 %v521_v9, %v505_v26  ;;  %vm475_vm15 = vcmp.gt.f32.partialorder %v782_v21, 0.01  ;;  %v451_v28 = vpop.f32.mrb[15].mxu1  ;;  %v587_v2 = vadd.f32 %v586_v3, %v585_v0 }
 0x1eb   :  { %v536_v29 = vadd.f32 %v520_v17, %v504_v15  ;;  %v491_v30 = vsel %vm475_vm15, 2.0, %v849_v18  ;;  %vm474_vm1 = vcmp.gt.f32.partialorder %v451_v28, 0.01  ;;  %v568_v19 = vld [vmem:[#allocation2 + $0x48] sm:$0xff] }
 0x1ec   :  { %553 = vst.msk [vmem:[#allocation2 + $0x68] sm:$0xff] %vm22_vm0, %v537_v27  ;;  %v523_v20 = vmul.f32 %v491_v30, %v102_v25  ;;  %v490_v33 = vsel %vm474_vm1, 2.0, %v849_v18  ;;  %v567_v35 = vld [vmem:[#allocation2 + $0x40] sm:$0xff]  ;;  %v589_v36 = vadd.f32 %v588_v32, %v587_v2  ;;  %v592_v23 = vsel %vm22_vm0, %v568_v19, 0.0 }
 0x1ed   :  { %552 = vst.msk [vmem:[#allocation2 + $0x60] sm:$0xff] %vm22_vm0, %v536_v29  ;;  %v522_v37 = vmul.f32 %v490_v33, %v101_v24  ;;  %v590_v38 = vsel %vm22_vm0, %v567_v35, 0.0 }
 0x1ee   :  { %v539_v39 = vadd.f32 %v523_v20, %v507_v31  ;;  %v591_v7 = vadd.f32 %v590_v38, %v589_v36 }
 0x1ef   :  { %v538_v40 = vadd.f32 %v522_v37, %v506_v34  ;;  %v570_v41 = vld [vmem:[#allocation2 + $0x58] sm:$0xff] }
 0x1f0   :  { %555 = vst.msk [vmem:[#allocation2 + $0x78] sm:$0xff] %vm22_vm0, %v539_v39  ;;  %v569_v6 = vld [vmem:[#allocation2 + $0x50] sm:$0xff]  ;;  %v593_v42 = vadd.f32 %v592_v23, %v591_v7  ;;  %v596_v44 = vsel %vm22_vm0, %v570_v41, 0.0 }
 0x1f1   :  { %554 = vst.msk [vmem:[#allocation2 + $0x70] sm:$0xff] %vm22_vm0, %v538_v40  ;;  %v594_v18 = vsel %vm22_vm0, %v569_v6, 0.0 }
 0x1f2   :  { %v595_v43 = vadd.f32 %v594_v18, %v593_v42 }
 0x1f3   :  { %v572_v46 = vld [vmem:[#allocation2 + $0x68] sm:$0xff] }
 0x1f4   :  { %v571_v45 = vld [vmem:[#allocation2 + $0x60] sm:$0xff]  ;;  %v597_v47 = vadd.f32 %v596_v44, %v595_v43  ;;  %v600_v50 = vsel %vm22_vm0, %v572_v46, 0.0 }
 0x1f5   :  { %v598_v48 = vsel %vm22_vm0, %v571_v45, 0.0 }
 0x1f6   :  { %v599_v49 = vadd.f32 %v598_v48, %v597_v47 }
 0x1f7   :  { %v574_v52 = vld [vmem:[#allocation2 + $0x78] sm:$0xff] }
 0x1f8   :  { %v573_v51 = vld [vmem:[#allocation2 + $0x70] sm:$0xff]  ;;  %v601_v22 = vadd.f32 %v600_v50, %v599_v49  ;;  %v604_v54 = vsel %vm22_vm0, %v574_v52, 0.0 }
 0x1f9   :  { %v602_v11 = vsel %vm22_vm0, %v573_v51, 0.0 }
 0x1fa   :  { %v603_v53 = vadd.f32 %v602_v11, %v601_v22 }
 0x1fc   :  { %v605_v55 = vadd.f32 %v604_v54, %v603_v53 }
 0x1fe   :  { %606 = vadd.xlane.f32.xlu0 %v605_v55 }
 0x28b   :  { %v607_v56 = vpop.xlane.xlu0 %606 }
 0x28c   :  { %v608_v10 = vrot.slane %v607_v56, 4 }
 0x28e   :  { %v609_v57 = vadd.f32 %v608_v10, %v607_v56 }
 0x290   :  { %v610_v58 = vrot.slane %v609_v57, 2 }
 0x292   :  { %v611_v59 = vadd.f32 %v610_v58, %v609_v57 }
 0x294   :  { %v612_v60 = vrot.slane %v611_v59, 1 }
 0x296   :  { %v613_v61 = vadd.f32 %v612_v60, %v611_v59 }
 0x298   :  { %819 = vpush %v613_v61 }
 0x2c9   :  { %s820_s30 = spop %819 }
 0x2ca   :  { %v615_v62 = vstv %s820_s30 }
 0x2cb   :  { %618 = vst.msk [vmem:[#allocation3] sm:$0x1] %vm617_vm2, %v615_v62 }
 0x2cc   :  { %835 = shalt.err (!%p832_p4)
}
 0x2cd   :  { %s836_s9 = scalar_lea.hbm %s1186_s4, 16 }
 0x2ce   :  { %p837_p5 = scmp.ne.s32.totalorder %s1186_s4, %s836_s9  ;;  %p840_p6 = scmp.lt.u32.totalorder %s836_s9, %s1186_s4 }
 0x2d0   :  { %p842_p7 = pnand %p840_p6, %p837_p5 }
 0x2d2   :  { %845 = shalt.err (!%p842_p7)
}
 0x2d3   :  { %628 = dma.vmem_to_hbm [thread:$0]  %s626_s1, 16, %s1186_s4, [#allocation4]  }
 0x2d4   :  { %846 = dma.done.wait [#allocation4], 16  }
 0x2d5   :  { %847 = vsyncadd [#allocation4], 4294967280 }
 0x2d6   :  { %632 = vsyncpa [#allocation4], 1 }

</bundles_post_ra>
